<compile_context>
chip_gen: v6e
topology: v6e:2x2x1
jax: 0.10.0
libtpu: 0.0.40
codegen_flags: <defaults>
</compile_context>

<pallas_src>
import numpy as np

import jax
import jax.numpy as jnp
from jax import lax
from jax.experimental import pallas as pl
from jax.experimental.pallas import tpu as pltpu


def _round_up(n, m):
    return ((n + m - 1) // m) * m


def _vmem_budget_bytes():
    """Generation-aware VMEM budget (v7x has 64 MiB/core, v5e/v6e 128 MiB)."""
    try:
        cap = int(pltpu.get_tpu_info().vmem_capacity_bytes)
    except Exception:
        cap = 64 << 20  # conservative default: v7x per-TensorCore VMEM
    return max(min(int(cap * 0.6), 96 << 20), 8 << 20)


def _choose_rows_tile(n_rows, f, in_itemsize, n_big_outs, out_itemsize,
                      vmem_budget_bytes, target_step_bytes=4 << 20,
                      max_rows=8192):
    """Pick a rows-per-block tile sized by bytes/step under a VMEM budget."""
    lanes = _round_up(max(f, 128), 128)  # F < 128 still occupies 128 lanes
    # Per-row VMEM: double-buffered input + big-output blocks plus ~6 live
    # f32 intermediates (x, xm, e, p, centered, hard/et).
    vmem_per_row = lanes * 4 * (2 + 2 * n_big_outs + 6)
    rows_vmem = max(((vmem_budget_bytes // max(vmem_per_row, 1)) // 8) * 8, 8)
    # Per-row HBM traffic: sizes the step so the ~0.35us/step overhead amortizes.
    hbm_per_row = f * (in_itemsize + n_big_outs * out_itemsize) + 8
    rows_hbm = max(((target_step_bytes // max(hbm_per_row, 1)) // 8) * 8, 8)
    rows = min(rows_vmem, rows_hbm, max_rows, _round_up(n_rows, 8))
    # Keep >= 2 grid steps when possible (shard across both TensorCores on v7x).
    if rows >= n_rows and n_rows > 8:
        rows = max(_round_up((n_rows + 1) // 2, 8), 8)
    # Prefer a tile that divides n_rows exactly (no ragged tail -> no OOB reads
    # and no wrapper-side [:N] slices), but never shrink below half the target.
    if n_rows % rows != 0:
        for r in range(rows, max(rows // 2, 8) - 1, -8):
            if n_rows % r == 0:
                return r
    return rows


def _make_vq_kernel(prob_msk, inv_temp, n_rows, rows_tile, F,
                    emit_hard, compute_soft, emit_targets, ragged):
    """Builds the Pallas kernel closure (all configuration is static)."""
    prob_msk = tuple(int(i) for i in prob_msk)
    neg_inf = float("-inf")

    def kernel(x_ref, *out_refs):
        refs = list(out_refs)
        hard_ref = refs.pop(0) if emit_hard else None
        soft_ref = refs.pop(0) if compute_soft else None
        ent_ref = refs.pop(0)
        tgt_ref = refs.pop(0) if emit_targets else None
        hp_ref, ap_ref = refs

        x = x_ref[...].astype(jnp.float32)                        # (R, F)

        # Codebook mask rebuilt in-kernel from a lane iota + static indices
        # (no captured array constants).
        col = lax.broadcasted_iota(jnp.int32, (1, F), 1)          # (1, F)
        if prob_msk:
            mask = (col == prob_msk[0])
            for i in prob_msk[1:]:
                mask = mask | (col == i)
        else:
            mask = jnp.zeros((1, F), jnp.bool_)
        xm = jnp.where(mask, neg_inf, x)                          # (R, F)

        # Row validity (only the final ragged block can have invalid rows).
        base = pl.program_id(0) * rows_tile
        row_ids = lax.broadcasted_iota(jnp.int32, (1, rows_tile), 1) + base
        valid_row = (row_ids < n_rows).astype(jnp.float32)        # (1, R)
        if ragged:
            # Sanitize OOB rows to all-zeros so nothing downstream is NaN/inf;
            # they are excluded from the reductions via valid_row and their
            # per-row outputs are sliced off / dropped outside the kernel.
            rows_col = lax.broadcasted_iota(jnp.int32, (rows_tile, 1), 0) + base
            xm = jnp.where(rows_col < n_rows, xm, 0.0)

        # ---- argmax (first occurrence, like torch.max) + one-hot -----------
        m = jnp.max(xm, axis=-1, keepdims=True)                   # (R, 1)
        col_f = col.astype(jnp.float32)
        k_col = jnp.min(jnp.where(xm == m, col_f, jnp.float32(F)),
                        axis=-1, keepdims=True)                   # (R, 1)
        hard01 = (col_f == k_col).astype(jnp.float32)             # (R, F)
        if emit_hard:
            hard_ref[...] = hard01.astype(hard_ref.dtype)

        # ---- softmax (exact divide; feeds entropy + avg-prob perplexity) ---
        e = jnp.exp(xm - m)                                       # masked -> 0
        z = jnp.sum(e, axis=-1, keepdims=True)                    # (R, 1)
        p = e / z                                                 # (R, F)

        # Per-row entropy via log-Z identity: log(Z) - sum(p * (xm - m)).
        centered = p * jnp.where(mask, 0.0, xm - m)
        ent_col = jnp.log(z) - jnp.sum(centered, axis=-1, keepdims=True)

        # Lane-dense stores of the per-row scalars: (R, 1) -> (1, R).
        ent_ref[...] = jnp.transpose(ent_col, (1, 0)).reshape(1, 1, rows_tile)
        if emit_targets:
            tgt_ref[...] = jnp.transpose(k_col, (1, 0)).reshape(
                1, 1, rows_tile).astype(jnp.int32)

        # Per-block partial sums over valid rows (MXU, otherwise idle).
        hp_ref[...] = jnp.dot(valid_row, hard01,
                              preferred_element_type=jnp.float32).reshape(1, 1, F)
        ap_ref[...] = jnp.dot(valid_row, p,
                              preferred_element_type=jnp.float32).reshape(1, 1, F)

        # Temperature softmax only when the training soft path needs it.
        if compute_soft:
            et = jnp.exp((xm - m) * jnp.float32(inv_temp))
            zt = jnp.sum(et, axis=-1, keepdims=True)
            soft_ref[...] = (et / zt).astype(soft_ref.dtype)

    return kernel


def simple_vector_quantizer_forward(
    x,
    *,
    temp=0.1,
    prob_msk=(0, 2, 3),
    training=False,
    use_gumbel=False,
    hard=True,
    time_first=True,
    groundTruthPerplexity=None,
    produce_targets=True,
    feat_len=None,
    onehot_dtype=None,
    vmem_budget_bytes=None,
):
    """JAX/Pallas re-implementation of SimpleVectorQuantizer.forward (feat_len=None)."""
    # TODO(synk): feat_len-based per-utterance masking path not implemented.
    # TODO(synk): use_gumbel=True (F.gumbel_softmax) needs in-kernel RNG; not implemented.
    # TODO(synk): forward-only; straight-through / diversity-loss backward would need jax.custom_vjp.
    if feat_len is not None:
        raise NotImplementedError("feat_len masking not supported")
    if training and use_gumbel:
        raise NotImplementedError("gumbel softmax path not supported")

    if not time_first:
        x = jnp.swapaxes(x, 1, 2)
    B, T, F = x.shape
    N = B * T
    num_vars = F

    compute_soft = bool(training and (not hard) and (not use_gumbel))
    emit_hard = not compute_soft  # hard one-hot is dead in the soft-training path

    budget = int(vmem_budget_bytes) if vmem_budget_bytes else _vmem_budget_bytes()
    big_out_dtype = x.dtype if compute_soft else (onehot_dtype or x.dtype)
    rows_tile = _choose_rows_tile(
        N, F,
        in_itemsize=jnp.dtype(x.dtype).itemsize,
        n_big_outs=1,
        out_itemsize=jnp.dtype(big_out_dtype).itemsize,
        vmem_budget_bytes=budget,
    )
    grid_n = (N + rows_tile - 1) // rows_tile
    ragged = (N % rows_tile) != 0

    xf = x.reshape(N, F)  # no padding copy; ragged final block handled in-kernel

    kernel = _make_vq_kernel(prob_msk, 1.0 / float(temp), N, rows_tile, F,
                             emit_hard, compute_soft, produce_targets, ragged)

    row_spec = pl.BlockSpec((rows_tile, F), lambda i: (i, 0))
    lane_spec = pl.BlockSpec((1, 1, rows_tile), lambda i: (i, 0, 0))
    part_spec = pl.BlockSpec((1, 1, F), lambda i: (i, 0, 0))

    out_shape, out_specs = [], []
    if emit_hard:
        out_shape.append(jax.ShapeDtypeStruct((N, F), big_out_dtype))
        out_specs.append(row_spec)
    if compute_soft:
        out_shape.append(jax.ShapeDtypeStruct((N, F), x.dtype))
        out_specs.append(row_spec)
    out_shape.append(jax.ShapeDtypeStruct((grid_n, 1, rows_tile), jnp.float32))
    out_specs.append(lane_spec)
    if produce_targets:
        out_shape.append(jax.ShapeDtypeStruct((grid_n, 1, rows_tile), jnp.int32))
        out_specs.append(lane_spec)
    out_shape.append(jax.ShapeDtypeStruct((grid_n, 1, F), jnp.float32))
    out_specs.append(part_spec)
    out_shape.append(jax.ShapeDtypeStruct((grid_n, 1, F), jnp.float32))
    out_specs.append(part_spec)

    outs = pl.pallas_call(
        kernel,
        grid=(grid_n,),
        in_specs=[row_spec],
        out_specs=tuple(out_specs),
        out_shape=tuple(out_shape),
        compiler_params=pltpu.CompilerParams(
            dimension_semantics=("parallel",),
            vmem_limit_bytes=int(budget),
        ),
    )(xf)

    it = iter(outs)
    hard_x = next(it) if emit_hard else None
    soft_x = next(it) if compute_soft else None
    ent_out = next(it)
    tgt_out = next(it) if produce_targets else None
    hp_part = next(it)
    ap_part = next(it)

    # ---- tiny finalizations in XLA (per-block partials -> scalars) ----------
    hp = jnp.sum(hp_part.reshape(grid_n, F), axis=0) / N
    code_perplexity = jnp.exp(-jnp.sum(hp * jnp.log(hp + 1e-7)))
    ap = jnp.sum(ap_part.reshape(grid_n, F), axis=0) / N
    prob_perplexity = jnp.exp(-jnp.sum(ap * jnp.log(ap + 1e-7)))

    ent_flat = ent_out.reshape(grid_n * rows_tile)
    if ragged:
        ent_flat = ent_flat[:N]
    ent_per_t = jnp.mean(ent_flat.reshape(B, T), axis=0)

    # Forward-value selection (matches the PyTorch module's value semantics):
    #   eval                      -> hard one-hot
    #   training, hard=True (ST)  -> hard + soft - sg(soft) == hard numerically
    #   training, hard=False      -> softmax(x / temp)
    subword_prob = (soft_x if compute_soft else hard_x).reshape(B, T, F)

    if groundTruthPerplexity is not None:
        diversity_loss = (prob_perplexity - groundTruthPerplexity) ** 2 / float(
            (num_vars - groundTruthPerplexity) ** 2)
    else:
        diversity_loss = (num_vars - prob_perplexity) / num_vars

    result = {
        "num_vars": num_vars,
        "code_perplexity": code_perplexity,
        "ent_per_t": ent_per_t,
        "prob_perplexity": prob_perplexity,
        "temp": float(temp),
        "subword_prob": subword_prob,
        "diversity_loss": diversity_loss,
    }
    if produce_targets:
        tgt_flat = tgt_out.reshape(grid_n * rows_tile)
        if ragged:
            tgt_flat = tgt_flat[:N]
        result["targets"] = tgt_flat.reshape(B, T, 1)
    return result


def _reference_forward(x, temp, prob_msk, training, hard):
    """Pure-JAX reference mirroring the PyTorch module's forward values."""
    B, T, F = x.shape
    xf = x.reshape(-1, F).astype(jnp.float32)
    mask = jnp.zeros((F,), bool).at[jnp.array(list(prob_msk))].set(True)
    xm = jnp.where(mask[None, :], -jnp.inf, xf)
    k = jnp.argmax(xm, axis=-1)
    hard_x = jax.nn.one_hot(k, F, dtype=jnp.float32)
    hard_probs = hard_x.mean(axis=0)
    code_ppl = jnp.exp(-jnp.sum(hard_probs * jnp.log(hard_probs + 1e-7)))
    p = jax.nn.softmax(xm, axis=-1)
    avg_probs = p.mean(axis=0)
    prob_ppl = jnp.exp(-jnp.sum(avg_probs * jnp.log(avg_probs + 1e-7)))
    ent_per_t = jnp.mean(
        -jnp.sum(p * jnp.log(p + 1e-9), axis=-1).reshape(B, T), axis=0)
    if training and not hard:
        sub = jax.nn.softmax(xm / temp, axis=-1).reshape(B, T, F)
    else:
        sub = hard_x.reshape(B, T, F)
    return dict(code_perplexity=code_ppl, prob_perplexity=prob_ppl,
                ent_per_t=ent_per_t, subword_prob=sub,
                targets=k.reshape(B, T, 1))


if __name__ == "__main__":
    key = jax.random.PRNGKey(0)
    B, T, F = 2, 8, 32  # batch=2, seq=8, num_vars (codebook logits)=32
    x = jax.random.normal(key, (B, T, F), dtype=jnp.float32)

    # --- eval / hard path (subword_prob = hard one-hot) ----------------------
    res = simple_vector_quantizer_forward(
        x, temp=0.1, prob_msk=(0, 2, 3), training=False, hard=True,
        time_first=True)
    for v in res.values():
        if isinstance(v, jax.Array):
            jax.block_until_ready(v)

    ref = _reference_forward(x, 0.1, (0, 2, 3), training=False, hard=True)
    assert res["subword_prob"].shape == (B, T, F)
    assert res["targets"].shape == (B, T, 1)
    assert res["ent_per_t"].shape == (T,)
    np.testing.assert_allclose(np.asarray(res["subword_prob"]),
                               np.asarray(ref["subword_prob"]), atol=1e-6)
    np.testing.assert_array_equal(np.asarray(res["targets"]),
                                  np.asarray(ref["targets"]))
    np.testing.assert_allclose(np.asarray(res["ent_per_t"]),
                               np.asarray(ref["ent_per_t"]),
                               rtol=1e-4, atol=1e-3)
    np.testing.assert_allclose(float(res["code_perplexity"]),
                               float(ref["code_perplexity"]), rtol=1e-4)
    np.testing.assert_allclose(float(res["prob_perplexity"]),
                               float(ref["prob_perplexity"]), rtol=1e-4)
    # each hard row is a one-hot (sums to 1) and never selects a masked entry
    assert bool(jnp.allclose(jnp.sum(res["subword_prob"], axis=-1), 1.0,
                             atol=1e-5))
    assert not bool(jnp.any(jnp.isin(res["targets"], jnp.array([0, 2, 3]))))

    # --- training soft path (subword_prob = softmax(x/temp); no one-hot I/O) -
    res_soft = simple_vector_quantizer_forward(
        x, temp=0.1, prob_msk=(0, 2, 3), training=True, hard=False,
        time_first=True)
    for v in res_soft.values():
        if isinstance(v, jax.Array):
            jax.block_until_ready(v)
    ref_soft = _reference_forward(x, 0.1, (0, 2, 3), training=True, hard=False)
    np.testing.assert_allclose(np.asarray(res_soft["subword_prob"]),
                               np.asarray(ref_soft["subword_prob"]),
                               rtol=1e-4, atol=1e-5)
    np.testing.assert_allclose(np.asarray(res_soft["ent_per_t"]),
                               np.asarray(ref_soft["ent_per_t"]),
                               rtol=1e-4, atol=1e-3)

    print("KERNEL_OK")
</pallas_src>

<mosaic_0001>
module attributes {stable_mosaic.version = 11 : i64} {
  func.func @kernel(%arg0: i32, %arg1: memref<8x32xf32, #tpu.memory_space<vmem>>, %arg2: memref<8x32xf32, #tpu.memory_space<vmem>>, %arg3: memref<1x1x8xf32, #tpu.memory_space<vmem>>, %arg4: memref<1x1x8xi32, #tpu.memory_space<vmem>>, %arg5: memref<1x1x32xf32, #tpu.memory_space<vmem>>, %arg6: memref<1x1x32xf32, #tpu.memory_space<vmem>>) attributes {dimension_semantics = [#tpu.dimension_semantics<parallel>], iteration_bounds = array<i64: 2>, scalar_prefetch = 0 : i64, scratch_operands = 0 : i64, tpu.core_type = #tpu.core_type<tc>, window_params = [{transform_indices = @transform_0, window_bounds = array<i64: 8, 32>}, {transform_indices = @transform_1, window_bounds = array<i64: 8, 32>}, {transform_indices = @transform_2, window_bounds = array<i64: 1, 1, 8>}, {transform_indices = @transform_3, window_bounds = array<i64: 1, 1, 8>}, {transform_indices = @transform_4, window_bounds = array<i64: 1, 1, 32>}, {transform_indices = @transform_5, window_bounds = array<i64: 1, 1, 32>}]} {
    %c0 = arith.constant 0 : index
    %c0_0 = arith.constant 0 : index
    %0 = vector.load %arg1[%c0, %c0_0] : memref<8x32xf32, #tpu.memory_space<vmem>>, vector<8x32xf32>
    %1 = tpu.iota {dimensions = array<i32: 1>} : vector<1x32xi32>
    %c0_i32 = arith.constant 0 : i32
    %2 = vector.broadcast %c0_i32 : i32 to vector<1x32xi32>
    %3 = arith.cmpi eq, %1, %2 : vector<1x32xi32>
    %c2_i32 = arith.constant 2 : i32
    %4 = vector.broadcast %c2_i32 : i32 to vector<1x32xi32>
    %5 = arith.cmpi eq, %1, %4 : vector<1x32xi32>
    %6 = arith.ori %3, %5 : vector<1x32xi1>
    %c3_i32 = arith.constant 3 : i32
    %7 = vector.broadcast %c3_i32 : i32 to vector<1x32xi32>
    %8 = arith.cmpi eq, %1, %7 : vector<1x32xi32>
    %9 = arith.ori %6, %8 : vector<1x32xi1>
    %cst = arith.constant 0xFF800000 : f32
    %10 = vector.shape_cast %9 : vector<1x32xi1> to vector<1x32xi1>
    %11 = vector.broadcast %10 : vector<1x32xi1> to vector<8x32xi1>
    %12 = vector.broadcast %cst : f32 to vector<8x32xf32>
    %13 = arith.select %11, %12, %0 : vector<8x32xi1>, vector<8x32xf32>
    %c8_i32 = arith.constant 8 : i32
    %14 = arith.muli %arg0, %c8_i32 : i32
    %15 = tpu.iota {dimensions = array<i32: 1>} : vector<1x8xi32>
    %16 = vector.broadcast %14 : i32 to vector<1x8xi32>
    %17 = arith.addi %15, %16 : vector<1x8xi32>
    %c16_i32 = arith.constant 16 : i32
    %18 = vector.broadcast %c16_i32 : i32 to vector<1x8xi32>
    %19 = arith.cmpi slt, %17, %18 : vector<1x8xi32>
    %20 = arith.extui %19 : vector<1x8xi1> to vector<1x8xi32>
    %21 = arith.sitofp %20 : vector<1x8xi32> to vector<1x8xf32>
    %cst_1 = arith.constant dense<0xFF800000> : vector<8xf32>
    %22 = vector.multi_reduction <maximumf>, %13, %cst_1 [1] : vector<8x32xf32> to vector<8xf32>
    %23 = vector.shape_cast %22 : vector<8xf32> to vector<8x1xf32>
    %24 = arith.sitofp %1 : vector<1x32xi32> to vector<1x32xf32>
    %25 = vector.broadcast %23 : vector<8x1xf32> to vector<8x32xf32>
    %26 = arith.cmpf oeq, %13, %25 : vector<8x32xf32>
    %cst_2 = arith.constant 3.200000e+01 : f32
    %27 = vector.shape_cast %24 : vector<1x32xf32> to vector<1x32xf32>
    %28 = vector.broadcast %27 : vector<1x32xf32> to vector<8x32xf32>
    %29 = vector.broadcast %cst_2 : f32 to vector<8x32xf32>
    %30 = arith.select %26, %28, %29 : vector<8x32xi1>, vector<8x32xf32>
    %cst_3 = arith.constant dense<0x7F800000> : vector<8xf32>
    %31 = vector.multi_reduction <minimumf>, %30, %cst_3 [1] : vector<8x32xf32> to vector<8xf32>
    %32 = vector.shape_cast %31 : vector<8xf32> to vector<8x1xf32>
    %33 = vector.broadcast %24 : vector<1x32xf32> to vector<8x32xf32>
    %34 = vector.broadcast %32 : vector<8x1xf32> to vector<8x32xf32>
    %35 = arith.cmpf oeq, %33, %34 : vector<8x32xf32>
    %36 = arith.extui %35 : vector<8x32xi1> to vector<8x32xi32>
    %37 = arith.sitofp %36 : vector<8x32xi32> to vector<8x32xf32>
    %c0_4 = arith.constant 0 : index
    %c0_5 = arith.constant 0 : index
    %38 = vector.load %arg2[%c0_4, %c0_5] : memref<8x32xf32, #tpu.memory_space<vmem>>, vector<8x32xf32>
    tpu.vector_store %arg2[%c0_4, %c0_5], %37 {strides = array<i32>} : memref<8x32xf32, #tpu.memory_space<vmem>>, vector<8x32xf32>,
    %39 = vector.broadcast %23 : vector<8x1xf32> to vector<8x32xf32>
    %40 = arith.subf %13, %39 : vector<8x32xf32>
    %41 = math.exp %40 : vector<8x32xf32>
    %cst_6 = arith.constant dense<0.000000e+00> : vector<8xf32>
    %42 = vector.multi_reduction <add>, %41, %cst_6 [1] : vector<8x32xf32> to vector<8xf32>
    %43 = vector.shape_cast %42 : vector<8xf32> to vector<8x1xf32>
    %44 = vector.broadcast %43 : vector<8x1xf32> to vector<8x32xf32>
    %45 = arith.divf %41, %44 : vector<8x32xf32>
    %46 = vector.broadcast %23 : vector<8x1xf32> to vector<8x32xf32>
    %47 = arith.subf %13, %46 : vector<8x32xf32>
    %cst_7 = arith.constant 0.000000e+00 : f32
    %48 = vector.shape_cast %9 : vector<1x32xi1> to vector<1x32xi1>
    %49 = vector.broadcast %48 : vector<1x32xi1> to vector<8x32xi1>
    %50 = vector.broadcast %cst_7 : f32 to vector<8x32xf32>
    %51 = arith.select %49, %50, %47 : vector<8x32xi1>, vector<8x32xf32>
    %52 = arith.mulf %45, %51 : vector<8x32xf32>
    %53 = math.log %43 : vector<8x1xf32>
    %cst_8 = arith.constant dense<0.000000e+00> : vector<8xf32>
    %54 = vector.multi_reduction <add>, %52, %cst_8 [1] : vector<8x32xf32> to vector<8xf32>
    %55 = vector.shape_cast %54 : vector<8xf32> to vector<8x1xf32>
    %56 = arith.subf %53, %55 : vector<8x1xf32>
    %57 = tpu.transpose %56, [1, 0] : vector<8x1xf32> -> vector<1x8xf32>
    %58 = vector.shape_cast %57 : vector<1x8xf32> to vector<1x1x8xf32>
    %c0_9 = arith.constant 0 : index
    %c0_10 = arith.constant 0 : index
    %c0_11 = arith.constant 0 : index
    %59 = vector.load %arg3[%c0_9, %c0_10, %c0_11] : memref<1x1x8xf32, #tpu.memory_space<vmem>>, vector<1x1x8xf32>
    tpu.vector_store %arg3[%c0_9, %c0_10, %c0_11], %58 {strides = array<i32>} : memref<1x1x8xf32, #tpu.memory_space<vmem>>, vector<1x1x8xf32>,
    %60 = tpu.transpose %32, [1, 0] : vector<8x1xf32> -> vector<1x8xf32>
    %61 = vector.shape_cast %60 : vector<1x8xf32> to vector<1x1x8xf32>
    %62 = arith.fptosi %61 : vector<1x1x8xf32> to vector<1x1x8xi32>
    %c0_12 = arith.constant 0 : index
    %c0_13 = arith.constant 0 : index
    %c0_14 = arith.constant 0 : index
    %63 = vector.load %arg4[%c0_12, %c0_13, %c0_14] : memref<1x1x8xi32, #tpu.memory_space<vmem>>, vector<1x1x8xi32>
    tpu.vector_store %arg4[%c0_12, %c0_13, %c0_14], %62 {strides = array<i32>} : memref<1x1x8xi32, #tpu.memory_space<vmem>>, vector<1x1x8xi32>,
    %cst_15 = arith.constant dense<0.000000e+00> : vector<1x32xf32>
    %64 = tpu.matmul %21, %37, %cst_15 {dimension_numbers = #tpu.dot_dimension_numbers<[1], [0], [0], [1], [0, 0, 1, 1], [], []>} : vector<1x8xf32>, vector<8x32xf32>, vector<1x32xf32> -> vector<1x32xf32>
    %65 = vector.shape_cast %64 : vector<1x32xf32> to vector<1x1x32xf32>
    %c0_16 = arith.constant 0 : index
    %c0_17 = arith.constant 0 : index
    %c0_18 = arith.constant 0 : index
    %66 = vector.load %arg5[%c0_16, %c0_17, %c0_18] : memref<1x1x32xf32, #tpu.memory_space<vmem>>, vector<1x1x32xf32>
    tpu.vector_store %arg5[%c0_16, %c0_17, %c0_18], %65 {strides = array<i32>} : memref<1x1x32xf32, #tpu.memory_space<vmem>>, vector<1x1x32xf32>,
    %cst_19 = arith.constant dense<0.000000e+00> : vector<1x32xf32>
    %67 = tpu.matmul %21, %45, %cst_19 {dimension_numbers = #tpu.dot_dimension_numbers<[1], [0], [0], [1], [0, 0, 1, 1], [], []>} : vector<1x8xf32>, vector<8x32xf32>, vector<1x32xf32> -> vector<1x32xf32>
    %68 = vector.shape_cast %67 : vector<1x32xf32> to vector<1x1x32xf32>
    %c0_20 = arith.constant 0 : index
    %c0_21 = arith.constant 0 : index
    %c0_22 = arith.constant 0 : index
    %69 = vector.load %arg6[%c0_20, %c0_21, %c0_22] : memref<1x1x32xf32, #tpu.memory_space<vmem>>, vector<1x1x32xf32>
    tpu.vector_store %arg6[%c0_20, %c0_21, %c0_22], %68 {strides = array<i32>} : memref<1x1x32xf32, #tpu.memory_space<vmem>>, vector<1x1x32xf32>,
    return
  }
  func.func @transform_0(%arg0: i32) -> (i32, i32) {
    %c0_i32 = arith.constant 0 : i32
    %c0_i32_0 = arith.constant 0 : i32
    return %arg0, %c0_i32 : i32, i32
  }
  func.func @transform_1(%arg0: i32) -> (i32, i32) {
    %c0_i32 = arith.constant 0 : i32
    %c0_i32_0 = arith.constant 0 : i32
    return %arg0, %c0_i32 : i32, i32
  }
  func.func @transform_2(%arg0: i32) -> (i32, i32, i32) {
    %c0_i32 = arith.constant 0 : i32
    %c0_i32_0 = arith.constant 0 : i32
    %c0_i32_1 = arith.constant 0 : i32
    return %arg0, %c0_i32, %c0_i32_0 : i32, i32, i32
  }
  func.func @transform_3(%arg0: i32) -> (i32, i32, i32) {
    %c0_i32 = arith.constant 0 : i32
    %c0_i32_0 = arith.constant 0 : i32
    %c0_i32_1 = arith.constant 0 : i32
    return %arg0, %c0_i32, %c0_i32_0 : i32, i32, i32
  }
  func.func @transform_4(%arg0: i32) -> (i32, i32, i32) {
    %c0_i32 = arith.constant 0 : i32
    %c0_i32_0 = arith.constant 0 : i32
    %c0_i32_1 = arith.constant 0 : i32
    return %arg0, %c0_i32, %c0_i32_0 : i32, i32, i32
  }
  func.func @transform_5(%arg0: i32) -> (i32, i32, i32) {
    %c0_i32 = arith.constant 0 : i32
    %c0_i32_0 = arith.constant 0 : i32
    %c0_i32_1 = arith.constant 0 : i32
    return %arg0, %c0_i32, %c0_i32_0 : i32, i32, i32
  }
}

</mosaic_0001>

<bundles_post_ra>
// kernel: tpu_custom_call.1
= control target key start
LH: loop header
LB: loop body
LE: loop exit
PB: predicated region body
PF: predicated region fallthrough
CT: control target
= control target key end

     0   :  { %11 = vsyncpa [#allocation3], 0  ;;  %s1448_s0 = inlined_call_operand.hbm [shape: f32[16,32], index: 0, kind: input, shape index: {}]   ;;  %s1449_s1 = inlined_call_operand.hbm [shape: f32[16,32], index: 1, kind: output, shape index: {0}]   ;;  %s1450_s2 = inlined_call_operand.hbm [shape: f32[2,1,8], index: 2, kind: output, shape index: {1}]   ;;  %s1451_s3 = inlined_call_operand.hbm [shape: s32[2,1,8], index: 3, kind: output, shape index: {2}]   ;;  %s1452_s4 = inlined_call_operand.hbm [shape: f32[2,1,32], index: 4, kind: output, shape index: {3}]   ;;  %s1453_s5 = inlined_call_operand.hbm [shape: f32[2,1,32], index: 5, kind: output, shape index: {4}]  }
   0x1   :  { %13 = vsyncpa [#allocation3 + $0x1], 0 }
   0x2   :  { %14 = vsyncpa [#allocation4], 0 }
   0x3   :  { %16 = vsyncpa [#allocation4 + $0x1], 0 }
   0x4   :  { %17 = vsyncpa [#allocation7], 0 }
   0x5   :  { %19 = vsyncpa [#allocation7 + $0x1], 0 }
   0x6   :  { %20 = vsyncpa [#allocation10], 0 }
   0x7   :  { %22 = vsyncpa [#allocation10 + $0x1], 0  ;;  %s1149_s18 = smov 0   ;;  %s1151_s19 = smov 0  }
   0x8   :  { %s1153_s20 = smov 0   ;;  %s1155_s21 = smov 0  }
   0x9 LB: > { %s1170_s22 = sadd.s32 4294967295, %s1108_s21   ;;  %s1456_s23 = sadd.s32 4294967294, %s1108_s21   ;;  %s1108_s21 = sphi %s1155_s21, %s1474_s21   ;;  %s1104_s20 = sphi %s1153_s20, %s1473_s20   ;;  %s1100_s19 = sphi %s1151_s19, %s1472_s19   ;;  %s1096_s18 = sphi %s1149_s18, %s1471_s18  }
   0xa   : > { %s1174_s24 = sadd.s32 1, %s1108_s21   ;;  %s35_s25 = sadd.s32 1, %s1104_s20 }
   0xb   : > { %s32_s26 = ssub.s32 %s1108_s21, %s1174_s24  ;;  %p42_p0 = scmp.ne.s32.totalorder %s1104_s20, %s1100_s19 }
   0xc   : > { %p33_p1 = scmp.eq.s32.totalorder %s32_s26, 0  ;;  %p43_p2 = scmp.eq.s32.totalorder %s1108_s21, 0 }
   0xd   : > { %p48_p3 = scmp.ne.s32.totalorder %s1100_s19, %s1096_s18  ;;  %p49_p4 = scmp.eq.s32.totalorder %s1170_s22, 0 }
   0xe   : > { %s1186_s27 = scalar_select %p33_p1, %s1104_s20, %s35_s25  }
   0xf   : > { %p1188_p5 = por %p43_p2, %p42_p0  ;;  %p1192_p6 = por %p49_p4, %p48_p3 }
  0x10   : > { %p72_p7 = scmp.eq.s32.totalorder %s1170_s22, 1  ;;  %p78_p8 = scmp.eq.s32.totalorder %s1456_s23, 1 }
  0x11   : > { %s1458_s29 = scalar_select %p1192_p6, 1, 0 }
  0x12   : > { %p861_p10 = scmp.lt.s32.totalorder %s1108_s21, 2  ;;  %p1201_p11 = por %p72_p7, %p42_p0 }
  0x13   : > { %p1205_p12 = por %p78_p8, %p48_p3  ;;  %s202_s7 = sand.u32 1, %s1104_s20  }
  0x14   : > { %s1459_s30 = scalar_select %p1201_p11, 1, 0 }
  0x15   : > { %s1460_s6 = scalar_select %p1205_p12, 1, 0 }
  0x16   : > { %s795_s8 = sshll.u32 %s1108_s21, 7  ;;  %s794_s9 = sshll.u32 %s202_s7, 3 }
  0x17   : > { %s1214_s12 = scalar_lea.hbm %s1448_s0, %s795_s8  ;;  %s206_s13 = scalar_lea.vmem [#allocation2], %s794_s9 }
  0x18   : > { %s213_s14 = sshll.u32 %s206_s13, 4  ;;  %p1218_p13 = pnand %p861_p10, %p1188_p5  ;;  %s1222_s14 = int_to_ptr.vmem [resolvable:$true] %s213_s14 }
  0x19   : > { %s203_s16 = scalar_lea.sflag [#allocation3], %s202_s7  ;;  %s904_s17 = scalar_lea.hbm %s1214_s12, 128 }
  0x1a   : > { %p905_p2 = scmp.ne.s32.totalorder %s1214_s12, %s904_s17  ;;  %p906_p3 = pneg %p1218_p13 }
  0x1b   : > { %s909_s28 = scalar_lea.hbm %s1448_s0, 256  ;;  %p910_p5 = scmp.lt.s32.totalorder %s1214_s12, %s1448_s0 }
  0x1c   : > { %p907_p4 = pnand %p906_p3, %p905_p2  ;;  %p911_p8 = scmp.lt.s32.totalorder %s909_s28, %s904_s17 }
  0x1e   : > { %p908_p7 = pneg %p907_p4  ;;  %p912_p10 = por %p911_p8, %p910_p5 }
  0x20   : > { %p913_p9 = pnand %p912_p10, %p908_p7 }
  0x22   : > { %916 = shalt.err (!%p913_p9)
}
  0x23   : > { %s917_s7 = scalar_lea.vmem %s1222_s14, 128  ;;  %s1110_s10 = smov [#allocation2]  }
  0x24   : > { %p918_p0 = scmp.ne.s32.totalorder %s1222_s14, %s917_s7  ;;  %s922_s11 = sshll.u32 %s1110_s10, 4  ;;  %s923_s11 = int_to_ptr.vmem [resolvable:$false] %s922_s11 }
  0x25   : > { %s924_s13 = scalar_lea.vmem %s923_s11, 256  ;;  %p925_p4 = scmp.lt.s32.totalorder %s1222_s14, %s923_s11 }
  0x26   : > { %p920_p1 = pnand %p918_p0, %p906_p3  ;;  %p926_p12 = scmp.lt.s32.totalorder %s924_s13, %s917_s7 }
  0x28   : > { %p921_p2 = pneg %p920_p1  ;;  %p927_p11 = por %p926_p12, %p925_p4 }
  0x2a   : > { %p928_p6 = pnand %p927_p11, %p921_p2 }
  0x2c   : > { %931 = shalt.err (!%p928_p6)
}
  0x2d   : > { %844 = dma.hbm_to_vmem [thread:$0]  (!%p1218_p13), %s1214_s12, 128, %s1222_s14, %s203_s16  }
  0x2e   : > { %p1462_p9 = scmp.lt.s32.totalorder %s1108_s21, 3  ;;  %p1463_p7 = scmp.ge.s32.totalorder %s1108_s21, 1 }
  0x30   : > { %p219_p0 = pnand %p1463_p7, %p1462_p9 }
  0x31   : > { %s1249_s17 = sand.u32 (!%p219_p0), 1, %s1100_s19   ;;  %p1464_p6 = scmp.ne.s32.totalorder (!%p219_p0), %s1458_s29, 0 }
  0x32   : > { %222 = sbr.rel (%p219_p0) target bundleno = 678 (0x2a6), region = 24  ;;  %s797_s25 = sshll.u32 (!%p219_p0), %s1249_s17, 3 }
  0x33   : > { %s225_s26 = scalar_lea.sflag (!%p219_p0), [#allocation3], %s1249_s17  ;;  %s228_s15 = scalar_lea.vmem (!%p219_p0), [#allocation2], %s797_s25 }
  0x37   : > { %1079 = dma.done.wait (%p1464_p6), %s225_s26, 128  }
  0x38   : > { %1081 = vsyncadd (%p1464_p6), %s225_s26, 4294967168  ;;  %v272_v0 = vlaneseq  ;;  %vm288_vm5 = vcmask 261120   ;;  %v271_v3 = vld [vmem:[%s228_s15] sm:$0xff]  ;;  %v1111_v12 = vmov 0.0   ;;  %vm1112_vm7 = vmmov 0   ;;  %s799_s29 = sshll.u32 %s1170_s22, 3 }
  0x39   : > { %817 = vmatprep.subr.mxu0 %v1111_v12  ;;  %822 = vmatprep.subr.mxu1 %v1111_v12  ;;  %v283_v15 = vstv %s799_s29  ;;  %vm386_vm9 = vcmask 64512   ;;  %v1113_v20 = vmov 1.0   ;;  %s246_s12 = scalar_lea.vmem [#allocation5], %s797_s25  ;;  %vm350_vm11 = vcmask 57344   ;;  %s806_s14 = sshll.u32 %s1170_s22, 7 }
  0x3a   : > { %v273_v1 = vand.u32 127, %v272_v0  ;;  %819 = vmatprep.mubr.msk.f32.mxu0 %vm1112_vm7, %v1111_v12  ;;  %824 = vmatprep.mubr.msk.f32.mxu1 %vm1112_vm7, %v1111_v12  ;;  %s561_s8 = scalar_lea.hbm %s1449_s1, %s806_s14  ;;  %s563_s9 = sshll.u32 %s246_s12, 4  ;;  %s564_s9 = int_to_ptr.vmem [resolvable:$true] %s563_s9 }
  0x3b   : > { %s534_s7 = scalar_lea.sflag [#allocation4], %s1249_s17  ;;  %s932_s10 = scalar_lea.vmem %s564_s9, 128 }
  0x3c   : > { %vm274_vm0 = vcmp.eq.s32.totalorder %v273_v1, 0  ;;  %vm275_vm1 = vcmp.eq.s32.totalorder %v273_v1, 2  ;;  %vm277_vm2 = vcmp.eq.s32.totalorder %v273_v1, 3  ;;  %v292_v6 = vcvt.s32.f32 %v273_v1  ;;  %p933_p11 = scmp.ne.s32.totalorder %s564_s9, %s932_s10  ;;  %p1467_p12 = scmp.ne.s32.totalorder %s1459_s30, 0 }
  0x3d   : > { %vm276_vm3 = vmor %vm274_vm0, %vm275_vm1  ;;  %v284_v16 = vadd.s32 %v283_v15, %v273_v1  ;;  %s1114_s11 = smov [#allocation5]  }
  0x3e   : > { %vm1259_vm4 = vmor %vm276_vm3, %vm277_vm2  ;;  %p934_p13 = pnand %p933_p11, %p1467_p12  ;;  %s936_s13 = sshll.u32 %s1114_s11, 4  ;;  %s937_s13 = int_to_ptr.vmem [resolvable:$false] %s936_s13 }
  0x3f   : > { %v281_v4 = vsel %vm1259_vm4, -inf, %v271_v3  ;;  %vm285_vm8 = vcmp.lt.s32.totalorder %v284_v16, 16  ;;  %s938_s25 = scalar_lea.vmem %s937_s13, 256  ;;  %p939_p3 = scmp.lt.s32.totalorder %s564_s9, %s937_s13 }
  0x40   : > { %v289_v5 = vsel %vm288_vm5, %v281_v4, -inf  ;;  %v800_v18 = vsel %vm285_vm8, 1.0, %v1111_v12  ;;  %p935_p1 = pneg %p934_p13  ;;  %p940_p5 = scmp.lt.s32.totalorder %s938_s25, %s932_s10 }
  0x41   : > { %290 = vmax.xlane.f32.xlu0 %v289_v5 }
  0x42   : > { %p941_p8 = por %p940_p5, %p939_p3 }
  0x44   : > { %p942_p10 = pnand %p941_p8, %p935_p1 }
  0xca   : > { %v291_v7 = vpop.xlane.xlu0 %290 }
  0xcb   : > { %v302_v8 = vsub.f32 %v281_v4, %v291_v7  ;;  %vm293_vm6 = vcmp.eq.f32.partialorder %v281_v4, %v291_v7 }
  0xcc   : > { %v294_v9 = vsel %vm293_vm6, %v292_v6, 32.0 }
  0xcd   : > { %v303_v10 = vmul.f32 1.442695, %v302_v8  ;;  %v295_v11 = vsel %vm288_vm5, %v294_v9, inf  ;;  %v310_v24 = vsel %vm1259_vm4, 0.0, %v302_v8 }
  0xce   : > { %296 = vmin.xlane.f32.xlu1 %v295_v11 }
  0xcf   : > { %898 = vpow2.f32 %v303_v10 }
  0xdc   : > { %v899_v13 = vpop.eup %898 }
  0xdd   : > { %v305_v14 = vsel %vm288_vm5, %v899_v13, 0.0 }
  0xde   : > { %306 = vadd.xlane.f32.xlu0 %v305_v14 }
 0x157   : > { %v297_v17 = vpop.xlane.xlu1 %296 }
 0x158   : > { %352 = vxpose.xlu0.b32.start.end [1/1] (short) (narrow) %v297_v17, 8  ;;  %vm298_vm10 = vcmp.eq.f32.partialorder %v292_v6, %v297_v17 }
 0x159   : > { %v801_v19 = vsel %vm298_vm10, 1.0, %v1111_v12  ;;  %818 = vmatpush3.msk.msra.mxu0 %vm298_vm10, %v1113_v20 }
 0x15a   : > { %820 = vmatmul.mubr.msk.f32.vlgmr.msra.gmra.mxu0 %vm386_vm9, %v800_v18  ;;  %301 = vst.msk [vmem:[%s246_s12] sm:$0xff] %vm288_vm5, %v801_v19 }
 0x167   : > { %v307_v21 = vpop.xlane.xlu0 %306 }
 0x168   : > { %900 = vrcp.f32 %v307_v21 }
 0x169   : > { %902 = vlog2.f32 %v307_v21 }
 0x175   : > { %v901_v22 = vpop.eup %900 }
 0x176   : > { %v309_v23 = vmul.f32 %v901_v22, %v899_v13  ;;  %v903_v27 = vpop.eup %902 }
 0x177   : > { %v313_v29 = vmul.f32 0.6931472, %v903_v27 }
 0x178   : > { %823 = vmatpush3.msra.mxu1 %v309_v23  ;;  %v311_v25 = vmul.f32 %v310_v24, %v309_v23 }
 0x179   : > { %825 = vmatmul.mubr.msk.f32.vlgmr.msra.gmra.mxu1 %vm386_vm9, %v800_v18 }
 0x17a   : > { %v314_v26 = vsel %vm288_vm5, %v311_v25, 0.0 }
 0x17b   : > { %315 = vadd.xlane.f32.xlu1 %v314_v26 }
 0x1d4   : > { %v368_v28 = vpop.trf.xlu0 }
 0x1d5   : > { %v827_v31 = vtrunc.f32 %v368_v28 }
 0x1d7   : > { %v828_v33 = vcvt.f32.s32 %v827_v31 }
 0x204   : > { %v316_v30 = vpop.xlane.xlu1 %315 }
 0x205   : > { %v317_v32 = vsub.f32 %v313_v29, %v316_v30 }
 0x207   : > { %318 = vxpose.xlu1.b32.start.end [1/1] (short) (narrow) %v317_v32, 8 }
 0x208   : > { %945 = shalt.err (!%p942_p10)
}
 0x209   : > { %s946_s26 = scalar_lea.hbm %s561_s8, 128  ;;  %s950_s12 = scalar_lea.hbm %s1449_s1, 256 }
 0x20a   : > { %p947_p2 = scmp.ne.s32.totalorder %s561_s8, %s946_s26  ;;  %p951_p7 = scmp.lt.s32.totalorder %s561_s8, %s1449_s1 }
 0x20b   : > { %p952_p0 = scmp.lt.s32.totalorder %s950_s12, %s946_s26 }
 0x20c   : > { %p948_p4 = pnand %p947_p2, %p1467_p12 }
 0x20d   : > { %p953_p6 = por %p952_p0, %p951_p7 }
 0x20e   : > { %p949_p9 = pneg %p948_p4 }
 0x210   : > { %p954_p11 = pnand %p953_p6, %p949_p9 }
 0x212   : > { %957 = shalt.err (!%p954_p11)
}
 0x213   : > { %831 = dma.vmem_to_hbm [thread:$0]  (%p1467_p12), %s564_s9, 128, %s561_s8, %s534_s7   ;;  %vm460_vm12 = vcmask 253952  }
 0x214   : > { %s258_s28 = scalar_lea.vmem [#allocation8], %s1249_s17  ;;  %s538_s10 = sand.u32 1, %s1170_s22  }
 0x215   : > { %385 = vst.msk [vmem:[%s258_s28] sm:$0x1] %vm350_vm11, %v828_v33  ;;  %s1300_s11 = sshll.u32 %s1170_s22, 4  ;;  %s264_s13 = scalar_lea.vmem [#allocation9], %s1249_s17 }
 0x216   : > { %s602_s25 = sshll.u32 %s264_s13, 4  ;;  %s1307_s29 = scalar_lea.hbm %s1452_s4, %s1300_s11  ;;  %s1309_s25 = int_to_ptr.vmem [resolvable:$true] %s602_s25 }
 0x217   : > { %s1314_s8 = scalar_lea.sflag [#allocation10], %s538_s10  ;;  %s958_s9 = scalar_lea.vmem %s1309_s25, 16 }
 0x218   : > { %p959_p13 = scmp.ne.s32.totalorder %s1309_s25, %s958_s9  ;;  %s1115_s7 = smov [#allocation9]  }
 0x219   : > { %s962_s12 = sshll.u32 %s1115_s7, 4  ;;  %s963_s12 = int_to_ptr.vmem [resolvable:$false] %s962_s12 }
 0x21a   : > { %v456_v34 = vpop.f32.mrf.mxu0  ;;  %p960_p1 = pnand %p959_p13, %p1467_p12  ;;  %s964_s14 = scalar_lea.vmem %s963_s12, 32 }
 0x21b   : > { %461 = vst.msk [vmem:[%s264_s13] sm:$0x1] %vm460_vm12, %v456_v34  ;;  %p965_p5 = scmp.lt.s32.totalorder %s1309_s25, %s963_s12  ;;  %p966_p8 = scmp.lt.s32.totalorder %s964_s14, %s958_s9 }
 0x21c   : > { %v821_v35 = vpop.f32.mrf.mxu0  ;;  %p961_p3 = pneg %p960_p1 }
 0x21d   : > { %p967_p10 = por %p966_p8, %p965_p5 }
 0x21f   : > { %p968_p2 = pnand %p967_p10, %p961_p3 }
 0x221   : > { %971 = shalt.err (!%p968_p2)
}
 0x222   : > { %s972_s16 = scalar_lea.hbm %s1307_s29, 16  ;;  %s976_s15 = scalar_lea.hbm %s1452_s4, 32 }
 0x223   : > { %p973_p4 = scmp.ne.s32.totalorder %s1307_s29, %s972_s16  ;;  %p977_p0 = scmp.lt.s32.totalorder %s1307_s29, %s1452_s4 }
 0x224   : > { %p978_p6 = scmp.lt.s32.totalorder %s976_s15, %s972_s16 }
 0x225   : > { %p974_p9 = pnand %p973_p4, %p1467_p12 }
 0x226   : > { %p979_p11 = por %p978_p6, %p977_p0 }
 0x227   : > { %p975_p7 = pneg %p974_p9 }
 0x229   : > { %p980_p13 = pnand %p979_p11, %p975_p7 }
 0x22b   : > { %983 = shalt.err (!%p980_p13)
}
 0x22c   : > { %834 = dma.vmem_to_hbm [thread:$0]  (%p1467_p12), %s1309_s25, 16, %s1307_s29, %s1314_s8  }
 0x22d   : > { %s270_s9 = scalar_lea.vmem [#allocation11], %s1249_s17  ;;  %s1342_s23 = scalar_lea.hbm %s1453_s5, %s1300_s11 }
 0x22e   : > { %s615_s12 = sshll.u32 %s270_s9, 4  ;;  %s1116_s26 = smov [#allocation11]   ;;  %s616_s12 = int_to_ptr.vmem [resolvable:$true] %s615_s12 }
 0x22f   : > { %s984_s16 = scalar_lea.vmem %s616_s12, 16  ;;  %s988_s15 = sshll.u32 %s1116_s26, 4  ;;  %s989_s15 = int_to_ptr.vmem [resolvable:$false] %s988_s15 }
 0x230   : > { %p985_p1 = scmp.ne.s32.totalorder %s616_s12, %s984_s16  ;;  %s990_s25 = scalar_lea.vmem %s989_s15, 32 }
 0x231   : > { %p991_p8 = scmp.lt.s32.totalorder %s616_s12, %s989_s15  ;;  %p992_p10 = scmp.lt.s32.totalorder %s990_s25, %s984_s16 }
 0x232   : > { %p986_p3 = pnand %p985_p1, %p1467_p12 }
 0x233   : > { %p993_p2 = por %p992_p10, %p991_p8 }
 0x234   : > { %p987_p5 = pneg %p986_p3 }
 0x236   : > { %p994_p4 = pnand %p993_p2, %p987_p5 }
 0x239   : > { %v528_v36 = vpop.f32.mrf.mxu1 }
 0x23a   : > { %532 = vst.msk [vmem:[%s270_s9] sm:$0x1] %vm460_vm12, %v528_v36 }
 0x23b   : > { %v826_v37 = vpop.f32.mrf.mxu1 }
 0x23c   : > { %997 = shalt.err (!%p994_p4)
}
 0x23d   : > { %s998_s29 = scalar_lea.hbm %s1342_s23, 16  ;;  %s1002_s14 = scalar_lea.hbm %s1453_s5, 32 }
 0x23e   : > { %p999_p9 = scmp.ne.s32.totalorder %s1342_s23, %s998_s29  ;;  %p1003_p6 = scmp.lt.s32.totalorder %s1342_s23, %s1453_s5 }
 0x23f   : > { %p1004_p11 = scmp.lt.s32.totalorder %s1002_s14, %s998_s29 }
 0x240   : > { %p1000_p7 = pnand %p999_p9, %p1467_p12 }
 0x241   : > { %p1005_p13 = por %p1004_p11, %p1003_p6 }
 0x242   : > { %p1001_p0 = pneg %p1000_p7 }
 0x244   : > { %p1006_p1 = pnand %p1005_p13, %p1001_p0 }
 0x246   : > { %1009 = shalt.err (!%p1006_p1)
}
 0x247   : > { %835 = dma.vmem_to_hbm [thread:$0]  (%p1467_p12), %s616_s12, 16, %s1342_s23, %s1314_s8  }
 0x248   : > { %s252_s16 = scalar_lea.vmem [#allocation6], %s1249_s17  ;;  %s589_s25 = sshll.u32 %s258_s28, 4  ;;  %s1379_s25 = int_to_ptr.vmem [resolvable:$true] %s589_s25 }
 0x249   : > { %s576_s15 = sshll.u32 %s252_s16, 4  ;;  %s1369_s9 = scalar_lea.hbm %s1450_s2, %s1300_s11  ;;  %s1371_s15 = int_to_ptr.vmem [resolvable:$true] %s576_s15 }
 0x24a   : > { %s1377_s26 = scalar_lea.hbm %s1451_s3, %s1300_s11  ;;  %s1384_s17 = scalar_lea.sflag [#allocation7], %s538_s10 }
 0x24b   : > { %s1010_s28 = scalar_lea.vmem %s1371_s15, 16  ;;  %s1117_s8 = smov [#allocation6]  }
 0x24c   : > { %p1011_p3 = scmp.ne.s32.totalorder %s1371_s15, %s1010_s28  ;;  %s1014_s12 = sshll.u32 %s1117_s8, 4  ;;  %s1015_s12 = int_to_ptr.vmem [resolvable:$false] %s1014_s12 }
 0x24d   : > { %s1016_s23 = scalar_lea.vmem %s1015_s12, 32  ;;  %p1017_p10 = scmp.lt.s32.totalorder %s1371_s15, %s1015_s12 }
 0x24e   : > { %p1012_p5 = pnand %p1011_p3, %p1467_p12  ;;  %p1018_p2 = scmp.lt.s32.totalorder %s1016_s23, %s1010_s28 }
 0x250   : > { %p1013_p8 = pneg %p1012_p5  ;;  %p1019_p4 = por %p1018_p2, %p1017_p10 }
 0x252   : > { %p1020_p9 = pnand %p1019_p4, %p1013_p8 }
 0x283   : > { %v334_v38 = vpop.trf.xlu1 }
 0x284   : > { %351 = vst.msk [vmem:[%s252_s16] sm:$0x1] %vm350_vm11, %v334_v38 }
 0x285   : > { %1023 = shalt.err (!%p1020_p9)
}
 0x286   : > { %s1024_s22 = scalar_lea.hbm %s1369_s9, 16  ;;  %s1028_s16 = scalar_lea.hbm %s1450_s2, 32 }
 0x287   : > { %p1025_p7 = scmp.ne.s32.totalorder %s1369_s9, %s1024_s22  ;;  %p1029_p11 = scmp.lt.s32.totalorder %s1369_s9, %s1450_s2 }
 0x288   : > { %p1030_p13 = scmp.lt.s32.totalorder %s1028_s16, %s1024_s22 }
 0x289   : > { %p1026_p0 = pnand %p1025_p7, %p1467_p12 }
 0x28a   : > { %p1031_p1 = por %p1030_p13, %p1029_p11 }
 0x28b   : > { %p1027_p6 = pneg %p1026_p0 }
 0x28d   : > { %p1032_p3 = pnand %p1031_p1, %p1027_p6 }
 0x28f   : > { %1035 = shalt.err (!%p1032_p3)
}
 0x290   : > { %832 = dma.vmem_to_hbm [thread:$0]  (%p1467_p12), %s1371_s15, 16, %s1369_s9, %s1384_s17  }
 0x291   : > { %s1036_s14 = scalar_lea.vmem %s1379_s25, 16  ;;  %s1118_s13 = smov [#allocation8]  }
 0x292   : > { %p1037_p5 = scmp.ne.s32.totalorder %s1379_s25, %s1036_s14  ;;  %s1040_s28 = sshll.u32 %s1118_s13, 4  ;;  %s1041_s28 = int_to_ptr.vmem [resolvable:$false] %s1040_s28 }
 0x293   : > { %s1042_s8 = scalar_lea.vmem %s1041_s28, 32  ;;  %p1043_p2 = scmp.lt.s32.totalorder %s1379_s25, %s1041_s28 }
 0x294   : > { %p1038_p8 = pnand %p1037_p5, %p1467_p12  ;;  %p1044_p4 = scmp.lt.s32.totalorder %s1042_s8, %s1036_s14 }
 0x296   : > { %p1039_p10 = pneg %p1038_p8  ;;  %p1045_p9 = por %p1044_p4, %p1043_p2 }
 0x298   : > { %p1046_p7 = pnand %p1045_p9, %p1039_p10 }
 0x29a   : > { %1049 = shalt.err (!%p1046_p7)
}
 0x29b   : > { %s1050_s12 = scalar_lea.hbm %s1377_s26, 16  ;;  %s1054_s23 = scalar_lea.hbm %s1451_s3, 32 }
 0x29c   : > { %p1051_p0 = scmp.ne.s32.totalorder %s1377_s26, %s1050_s12  ;;  %p1055_p13 = scmp.lt.s32.totalorder %s1377_s26, %s1451_s3 }
 0x29d   : > { %p1056_p1 = scmp.lt.s32.totalorder %s1054_s23, %s1050_s12 }
 0x29e   : > { %p1052_p6 = pnand %p1051_p0, %p1467_p12 }
 0x29f   : > { %p1057_p3 = por %p1056_p1, %p1055_p13 }
 0x2a0   : > { %p1053_p11 = pneg %p1052_p6 }
 0x2a2   : > { %p1058_p5 = pnand %p1057_p3, %p1053_p11 }
 0x2a4   : > { %1061 = shalt.err (!%p1058_p5)
}
 0x2a5   : > { %833 = dma.vmem_to_hbm [thread:$0]  (%p1467_p12), %s1379_s25, 16, %s1377_s26, %s1384_s17  }
 0x2a6 PF: > { %s627_s11 = sand.u32 1, %s1096_s18   ;;  %p1468_p8 = scmp.ne.s32.totalorder %s1460_s6, 0 }
 0x2a7   : > { %p1469_p10 = scmp.ge.s32.totalorder %s1108_s21, 2  ;;  %s628_s16 = scalar_lea.sflag [#allocation4], %s627_s11 }
 0x2a9   : > { %p846_p2 = pnand %p1469_p10, %p1468_p8 }
 0x2ab   : > { %p847_p4 = pneg %p846_p2 }
 0x2ad   : > { %1083 = dma.done.wait (%p847_p4), %s628_s16, 128  }
 0x2ae   : > { %1085 = vsyncadd (%p847_p4), %s628_s16, 4294967168  ;;  %s1470_s7 = sadd.s32 4294967294, %s1108_s21  }
 0x2af   : > { %s636_s29 = sand.u32 1, %s1470_s7  }
 0x2b0   : > { %s637_s30 = scalar_lea.sflag [#allocation7], %s636_s29 }
 0x2b1   : > { %1087 = dma.done.wait (%p847_p4), %s637_s30, 32  }
 0x2b2   : > { %1089 = vsyncadd (%p847_p4), %s637_s30, 4294967264  ;;  %s653_s14 = scalar_lea.sflag [#allocation10], %s636_s29 }
 0x2b3   : > { %1091 = dma.done.wait (%p847_p4), %s653_s14, 32  }
 0x2b4   : > { %1093 = vsyncadd (%p847_p4), %s653_s14, 4294967264  ;;  %p25_p12 = scmp.ge.s32.totalorder %s1174_s24, 4   ;;  %s1471_s18 = smov %s1100_s19 }
 0x2b5   : > { %s1472_s19 = smov %s1104_s20  ;;  %s1473_s20 = smov %s1186_s27 }
 0x2b6   : > { %s1474_s21 = smov %s1174_s24  ;;  %27 = sbr.rel (!%p25_p12) target bundleno = 9 (0x9), region = 133 }
 0x2bb   :  { %665 = vsyncpa [#allocation3], 1 }
 0x2bc   :  { %667 = vsyncpa [#allocation3 + $0x1], 1 }
 0x2bd   :  { %668 = vsyncpa [#allocation4], 1 }
 0x2be   :  { %670 = vsyncpa [#allocation4 + $0x1], 1 }
 0x2bf   :  { %671 = vsyncpa [#allocation7], 1 }
 0x2c0   :  { %673 = vsyncpa [#allocation7 + $0x1], 1 }
 0x2c1   :  { %674 = vsyncpa [#allocation10], 1 }
 0x2c2   :  { %676 = vsyncpa [#allocation10 + $0x1], 1 }

</bundles_post_ra>
